<compile_context>
chip_gen: v7x
topology: tpu7x:2x2x1
jax: 0.10.0
libtpu: 0.0.40
codegen_flags: <defaults>
</compile_context>

<pallas_src>
import functools
import math

import jax
import jax.numpy as jnp
from jax.experimental import pallas as pl
from jax.experimental.pallas import tpu as pltpu

LOG_SQRT_2PI = 0.5 * math.log(2.0 * math.pi)

_LANE = 128                       # TPU lane width; batch tiles are multiples of this
_MAX_BATCH_TILE = 4096            # per-tile footprint ~1-3 MiB double-buffered
_VMEM_LIMIT = 32 * 1024 * 1024    # safe scoped-VMEM budget on v5e/v6e/v7x


def _round_up(x, m):
    return ((x + m - 1) // m) * m


# --------------------------------------------------------------------------
# Kernels (batch-on-lane layout: activations are (features, batch_tile))
# --------------------------------------------------------------------------
def _mlp_mean_T(xT, w1_ref, b1_ref, w2_ref, b2_ref, w3_ref, b3_ref,
                w4_ref, b4_ref, compute_dtype):
    """Mean head (Linear->Tanh x3 -> Linear) on a (I, batch_tile) activation.

    Weights keep PyTorch's (out, in) orientation, so every matmul is W @ X
    with the batch streaming along the MXU's N/lane axis.  Matmuls accumulate
    in f32; hidden activations / tanh run in `compute_dtype` (bf16 doubles
    EUP/VPU throughput on v6e/v7x; keep f32 on v5e)."""
    h = xT.astype(compute_dtype)
    h = jnp.tanh((jnp.dot(w1_ref[...], h, preferred_element_type=jnp.float32)
                  + b1_ref[...]).astype(compute_dtype))
    h = jnp.tanh((jnp.dot(w2_ref[...], h, preferred_element_type=jnp.float32)
                  + b2_ref[...]).astype(compute_dtype))
    h = jnp.tanh((jnp.dot(w3_ref[...], h, preferred_element_type=jnp.float32)
                  + b3_ref[...]).astype(compute_dtype))
    return jnp.dot(w4_ref[...], h, preferred_element_type=jnp.float32) + b4_ref[...]


def _policy_sample_kernel(o_dim, compute_dtype,
                          x_ref, eps_ref,
                          w1_ref, b1_ref, w2_ref, b2_ref, w3_ref, b3_ref,
                          w4_ref, b4_ref, logstd_ref,
                          out_ref):
    # Inputs arrive in natural (batch_tile, features) layout; transpose to the
    # batch-on-lanes layout inside the kernel (XLU) instead of the wrapper.
    xT = x_ref[...].T                                            # (I, Bt)
    epsT = eps_ref[...].T                                        # (O, Bt), N(0,1)
    meanT = _mlp_mean_T(xT, w1_ref, b1_ref, w2_ref, b2_ref, w3_ref, b3_ref,
                        w4_ref, b4_ref, compute_dtype)           # (O, Bt) f32
    logstd = logstd_ref[...]                                     # (O, 1)
    std = jnp.exp(logstd)
    # Stacked lane-dense output slab: [actions ; log_prob ; mean].
    out_ref[0:o_dim, :] = meanT + std * epsT
    # (actions - mean) / std == eps  ->  divide-free log_prob.
    out_ref[o_dim:2 * o_dim, :] = -0.5 * (epsT * epsT) - logstd - LOG_SQRT_2PI
    out_ref[2 * o_dim:3 * o_dim, :] = meanT


def _policy_eval_kernel(o_dim, compute_dtype,
                        x_ref, act_ref,
                        w1_ref, b1_ref, w2_ref, b2_ref, w3_ref, b3_ref,
                        w4_ref, b4_ref, logstd_ref,
                        out_ref):
    xT = x_ref[...].T                                            # (I, Bt)
    actT = act_ref[...].T                                        # (O, Bt)
    meanT = _mlp_mean_T(xT, w1_ref, b1_ref, w2_ref, b2_ref, w3_ref, b3_ref,
                        w4_ref, b4_ref, compute_dtype)           # (O, Bt) f32
    logstd = logstd_ref[...]                                     # (O, 1)
    inv_std = jnp.exp(-logstd)                                   # no divide
    z = (actT - meanT) * inv_std
    # Stacked lane-dense output slab: [log_prob ; mean].
    out_ref[0:o_dim, :] = -0.5 * (z * z) - logstd - LOG_SQRT_2PI
    out_ref[o_dim:2 * o_dim, :] = meanT


# --------------------------------------------------------------------------
# Wrapper (mirrors PolicyNN.forward)
# --------------------------------------------------------------------------
def policy_forward(params, x, actions=None, *, key=None,
                   compute_dtype=jnp.float32):
    """Returns (actions, log_prob, entropy, actions_mean, actions_std) with
    shapes ((B,O), (B,O), (B,), (B,O), (O,)), matching the PyTorch module.

    params:        w1..w4 stored (out, in) [PyTorch orientation], b1..b4 (out,),
                   logstd (out,).
    key:           jax PRNGKey; required when actions is None (sampling path).
    compute_dtype: dtype for hidden matmuls / tanh (jnp.bfloat16 recommended on
                   v6e/v7x, jnp.float32 on v5e); outputs are always float32.
    """
    x = jnp.asarray(x, jnp.float32)
    B, I = x.shape
    O = params["w4"].shape[0]

    logstd = jnp.asarray(params["logstd"], jnp.float32)          # (O,)
    std = jnp.exp(logstd)                                        # (O,) returned as-is

    # Normal entropy is batch independent -> single scalar in the wrapper.
    entropy = jnp.broadcast_to(jnp.sum(logstd) + O * (0.5 + LOG_SQRT_2PI), (B,))

    # ---- batch tiling: lane-multiple tiles, >=2 grid steps when possible ---
    b_pad = _round_up(B, _LANE)
    # Cap tile at ~half the padded batch so v7x's two TensorCores both get work.
    half = max(_LANE, (b_pad // 2) // _LANE * _LANE)
    b_tile = min(_MAX_BATCH_TILE, half)
    b_pad = _round_up(b_pad, b_tile)
    grid = (b_pad // b_tile,)

    if b_pad != B:
        x = jnp.pad(x, ((0, b_pad - B), (0, 0)))

    w1 = jnp.asarray(params["w1"], compute_dtype)
    w2 = jnp.asarray(params["w2"], compute_dtype)
    w3 = jnp.asarray(params["w3"], compute_dtype)
    w4 = jnp.asarray(params["w4"], compute_dtype)
    b1 = jnp.asarray(params["b1"], jnp.float32).reshape(-1, 1)
    b2 = jnp.asarray(params["b2"], jnp.float32).reshape(-1, 1)
    b3 = jnp.asarray(params["b3"], jnp.float32).reshape(-1, 1)
    b4 = jnp.asarray(params["b4"], jnp.float32).reshape(-1, 1)
    logstd_col = logstd.reshape(-1, 1)

    weight_inputs = (w1, b1, w2, b2, w3, b3, w4, b4, logstd_col)
    # Tiny arrays: whole-array blocks + constant index_map -> VMEM-resident
    # across the whole grid.
    weight_specs = [pl.BlockSpec(a.shape, lambda i: (0, 0)) for a in weight_inputs]

    # Natural-layout input blocks (last block dim == full array dim).
    x_spec = pl.BlockSpec((b_tile, I), lambda i: (i, 0))
    oa_spec = pl.BlockSpec((b_tile, O), lambda i: (i, 0))

    compiler_params = pltpu.CompilerParams(
        dimension_semantics=("parallel",),    # batch tiles are independent
        vmem_limit_bytes=_VMEM_LIMIT,
    )

    if actions is None:
        if key is None:
            raise ValueError(
                "policy_forward: `key` (jax PRNGKey) is required when "
                "sampling (actions=None).")
        # TODO(synk): draw the noise in-kernel (pltpu.prng_seed + normal) once
        # the deployed Mosaic/interpreter supports it; wrapper-side
        # jax.random.normal keeps the kernel portable.
        eps = jax.random.normal(key, (b_pad, O), jnp.float32)
        out_spec = pl.BlockSpec((3 * O, b_tile), lambda i: (0, i))
        stackedT = pl.pallas_call(
            functools.partial(_policy_sample_kernel, O, compute_dtype),
            grid=grid,
            in_specs=[x_spec, oa_spec] + weight_specs,
            out_specs=out_spec,
            out_shape=jax.ShapeDtypeStruct((3 * O, b_pad), jnp.float32),
            compiler_params=compiler_params,
        )(x, eps, *weight_inputs)
        stacked = stackedT.T[:B]              # single transpose + slice
        actions_out = stacked[:, 0:O]
        log_prob = stacked[:, O:2 * O]
        mean = stacked[:, 2 * O:3 * O]
    else:
        act = jnp.asarray(actions, jnp.float32)
        if b_pad != B:
            act = jnp.pad(act, ((0, b_pad - B), (0, 0)))
        out_spec = pl.BlockSpec((2 * O, b_tile), lambda i: (0, i))
        stackedT = pl.pallas_call(
            functools.partial(_policy_eval_kernel, O, compute_dtype),
            grid=grid,
            in_specs=[x_spec, oa_spec] + weight_specs,
            out_specs=out_spec,
            out_shape=jax.ShapeDtypeStruct((2 * O, b_pad), jnp.float32),
            compiler_params=compiler_params,
        )(x, act, *weight_inputs)
        stacked = stackedT.T[:B]              # single transpose + slice
        log_prob = stacked[:, 0:O]
        mean = stacked[:, O:2 * O]
        # Given actions are returned directly (no redundant HBM round-trip).
        actions_out = jnp.asarray(actions, jnp.float32)

    return actions_out, log_prob, entropy, mean, std


def init_params(key, input_shape, h1, h2, h3, output_shape):
    """Deterministic init mimicking nn.Linear defaults (uniform +-1/sqrt(fan_in)).
    Weights are stored (out, in), exactly like PyTorch."""
    dims = [(input_shape, h1), (h1, h2), (h2, h3), (h3, output_shape)]
    params = {}
    for i, (fan_in, fan_out) in enumerate(dims, start=1):
        key, kw, kb = jax.random.split(key, 3)
        bound = 1.0 / math.sqrt(fan_in)
        params[f"w{i}"] = jax.random.uniform(
            kw, (fan_out, fan_in), jnp.float32, -bound, bound)
        params[f"b{i}"] = jax.random.uniform(
            kb, (fan_out,), jnp.float32, -bound, bound)
    params["logstd"] = jnp.zeros((output_shape,), jnp.float32)   # nn.Parameter(zeros)
    return params


if __name__ == "__main__":
    key = jax.random.PRNGKey(0)
    k_params, k_x, k_act, k_noise = jax.random.split(key, 4)

    B, INPUT, H1, H2, H3, OUTPUT = 8, 16, 32, 32, 32, 8
    params = init_params(k_params, INPUT, H1, H2, H3, OUTPUT)
    x = jax.random.normal(k_x, (B, INPUT), dtype=jnp.float32)

    # Path 1: actions=None -> sample actions ~ Normal(mean, std).
    out_sampled = policy_forward(params, x, actions=None, key=k_noise)
    jax.block_until_ready(out_sampled)

    # Path 2: actions provided -> evaluate log_prob / entropy at given actions.
    given_actions = jax.random.normal(k_act, (B, OUTPUT), dtype=jnp.float32)
    out_given = policy_forward(params, x, actions=given_actions)
    jax.block_until_ready(out_given)

    a_s, lp_s, ent_s, mu_s, sd_s = out_sampled
    a, lp, ent, mu, sd = out_given
    assert a_s.shape == (B, OUTPUT) and lp_s.shape == (B, OUTPUT)
    assert a.shape == (B, OUTPUT) and lp.shape == (B, OUTPUT)
    assert ent.shape == (B,) and mu.shape == (B, OUTPUT) and sd.shape == (OUTPUT,)

    # Cross-check the evaluate path against a pure-JAX reference.
    def ref_forward(p, xin, acts):
        h = jnp.tanh(xin @ p["w1"].T + p["b1"])
        h = jnp.tanh(h @ p["w2"].T + p["b2"])
        h = jnp.tanh(h @ p["w3"].T + p["b3"])
        mean = h @ p["w4"].T + p["b4"]
        ls = p["logstd"]
        s = jnp.exp(ls)
        logp = -((acts - mean) ** 2) / (2.0 * s * s) - ls - LOG_SQRT_2PI
        e = jnp.sum(0.5 + LOG_SQRT_2PI + jnp.broadcast_to(ls, mean.shape), axis=-1)
        return mean, logp, e

    with jax.default_matmul_precision("float32"):
        mu_ref, lp_ref, ent_ref = ref_forward(params, x, given_actions)

    assert jnp.allclose(mu, mu_ref, atol=1e-4, rtol=1e-4)
    assert jnp.allclose(lp, lp_ref, atol=1e-4, rtol=1e-4)
    assert jnp.allclose(ent, ent_ref, atol=1e-4, rtol=1e-4)

    # Sampling-path self-consistency: mean matches the reference mean, and
    # log_prob equals the Normal log-density at the sampled actions.
    assert jnp.allclose(mu_s, mu_ref, atol=1e-4, rtol=1e-4)
    lp_check = (-((a_s - mu_s) ** 2) / (2.0 * sd_s ** 2)
                - jnp.log(sd_s) - LOG_SQRT_2PI)
    assert jnp.allclose(lp_s, lp_check, atol=1e-4, rtol=1e-4)

    # bf16 hidden-compute path (recommended on v6e/v7x) -- smoke test.
    _, _, _, mu_b, _ = policy_forward(
        params, x, actions=given_actions, compute_dtype=jnp.bfloat16)
    jax.block_until_ready(mu_b)
    assert mu_b.shape == (B, OUTPUT) and bool(jnp.all(jnp.isfinite(mu_b)))

    print("KERNEL_OK")
</pallas_src>

<mosaic_0001>
module attributes {stable_mosaic.version = 11 : i64} {
  func.func @_policy_sample_kernel(%arg0: i32, %arg1: memref<128x16xf32, #tpu.memory_space<vmem>>, %arg2: memref<128x8xf32, #tpu.memory_space<vmem>>, %arg3: memref<32x16xf32, #tpu.memory_space<vmem>>, %arg4: memref<32x1xf32, #tpu.memory_space<vmem>>, %arg5: memref<32x32xf32, #tpu.memory_space<vmem>>, %arg6: memref<32x1xf32, #tpu.memory_space<vmem>>, %arg7: memref<32x32xf32, #tpu.memory_space<vmem>>, %arg8: memref<32x1xf32, #tpu.memory_space<vmem>>, %arg9: memref<8x32xf32, #tpu.memory_space<vmem>>, %arg10: memref<8x1xf32, #tpu.memory_space<vmem>>, %arg11: memref<8x1xf32, #tpu.memory_space<vmem>>, %arg12: memref<24x128xf32, #tpu.memory_space<vmem>>) attributes {dimension_semantics = [#tpu.dimension_semantics<parallel>], iteration_bounds = array<i64: 1>, scalar_prefetch = 0 : i64, scratch_operands = 0 : i64, tpu.core_type = #tpu.core_type<tc>, window_params = [{transform_indices = @transform_0, window_bounds = array<i64: 128, 16>}, {transform_indices = @transform_1, window_bounds = array<i64: 128, 8>}, {pipeline_mode = #tpu.pipeline_mode<synchronous>, transform_indices = @transform_2, window_bounds = array<i64: 32, 16>}, {pipeline_mode = #tpu.pipeline_mode<synchronous>, transform_indices = @transform_3, window_bounds = array<i64: 32, 1>}, {pipeline_mode = #tpu.pipeline_mode<synchronous>, transform_indices = @transform_4, window_bounds = array<i64: 32, 32>}, {pipeline_mode = #tpu.pipeline_mode<synchronous>, transform_indices = @transform_5, window_bounds = array<i64: 32, 1>}, {pipeline_mode = #tpu.pipeline_mode<synchronous>, transform_indices = @transform_6, window_bounds = array<i64: 32, 32>}, {pipeline_mode = #tpu.pipeline_mode<synchronous>, transform_indices = @transform_7, window_bounds = array<i64: 32, 1>}, {pipeline_mode = #tpu.pipeline_mode<synchronous>, transform_indices = @transform_8, window_bounds = array<i64: 8, 32>}, {pipeline_mode = #tpu.pipeline_mode<synchronous>, transform_indices = @transform_9, window_bounds = array<i64: 8, 1>}, {pipeline_mode = #tpu.pipeline_mode<synchronous>, transform_indices = @transform_10, window_bounds = array<i64: 8, 1>}, {transform_indices = @transform_11, window_bounds = array<i64: 24, 128>}]} {
    %c0 = arith.constant 0 : index
    %c0_0 = arith.constant 0 : index
    %0 = vector.load %arg1[%c0, %c0_0] : memref<128x16xf32, #tpu.memory_space<vmem>>, vector<128x16xf32>
    %1 = tpu.transpose %0, [1, 0] : vector<128x16xf32> -> vector<16x128xf32>
    %c0_1 = arith.constant 0 : index
    %c0_2 = arith.constant 0 : index
    %2 = vector.load %arg2[%c0_1, %c0_2] : memref<128x8xf32, #tpu.memory_space<vmem>>, vector<128x8xf32>
    %3 = tpu.transpose %2, [1, 0] : vector<128x8xf32> -> vector<8x128xf32>
    %c0_3 = arith.constant 0 : index
    %c0_4 = arith.constant 0 : index
    %4 = vector.load %arg3[%c0_3, %c0_4] : memref<32x16xf32, #tpu.memory_space<vmem>>, vector<32x16xf32>
    %cst = arith.constant dense<0.000000e+00> : vector<32x128xf32>
    %5 = tpu.matmul %4, %1, %cst {dimension_numbers = #tpu.dot_dimension_numbers<[1], [0], [0], [1], [0, 0, 1, 1], [], []>} : vector<32x16xf32>, vector<16x128xf32>, vector<32x128xf32> -> vector<32x128xf32>
    %c0_5 = arith.constant 0 : index
    %c0_6 = arith.constant 0 : index
    %6 = vector.load %arg4[%c0_5, %c0_6] : memref<32x1xf32, #tpu.memory_space<vmem>>, vector<32x1xf32>
    %7 = vector.broadcast %6 : vector<32x1xf32> to vector<32x128xf32>
    %8 = arith.addf %5, %7 : vector<32x128xf32>
    %9 = math.tanh %8 : vector<32x128xf32>
    %c0_7 = arith.constant 0 : index
    %c0_8 = arith.constant 0 : index
    %10 = vector.load %arg5[%c0_7, %c0_8] : memref<32x32xf32, #tpu.memory_space<vmem>>, vector<32x32xf32>
    %cst_9 = arith.constant dense<0.000000e+00> : vector<32x128xf32>
    %11 = tpu.matmul %10, %9, %cst_9 {dimension_numbers = #tpu.dot_dimension_numbers<[1], [0], [0], [1], [0, 0, 1, 1], [], []>} : vector<32x32xf32>, vector<32x128xf32>, vector<32x128xf32> -> vector<32x128xf32>
    %c0_10 = arith.constant 0 : index
    %c0_11 = arith.constant 0 : index
    %12 = vector.load %arg6[%c0_10, %c0_11] : memref<32x1xf32, #tpu.memory_space<vmem>>, vector<32x1xf32>
    %13 = vector.broadcast %12 : vector<32x1xf32> to vector<32x128xf32>
    %14 = arith.addf %11, %13 : vector<32x128xf32>
    %15 = math.tanh %14 : vector<32x128xf32>
    %c0_12 = arith.constant 0 : index
    %c0_13 = arith.constant 0 : index
    %16 = vector.load %arg7[%c0_12, %c0_13] : memref<32x32xf32, #tpu.memory_space<vmem>>, vector<32x32xf32>
    %cst_14 = arith.constant dense<0.000000e+00> : vector<32x128xf32>
    %17 = tpu.matmul %16, %15, %cst_14 {dimension_numbers = #tpu.dot_dimension_numbers<[1], [0], [0], [1], [0, 0, 1, 1], [], []>} : vector<32x32xf32>, vector<32x128xf32>, vector<32x128xf32> -> vector<32x128xf32>
    %c0_15 = arith.constant 0 : index
    %c0_16 = arith.constant 0 : index
    %18 = vector.load %arg8[%c0_15, %c0_16] : memref<32x1xf32, #tpu.memory_space<vmem>>, vector<32x1xf32>
    %19 = vector.broadcast %18 : vector<32x1xf32> to vector<32x128xf32>
    %20 = arith.addf %17, %19 : vector<32x128xf32>
    %21 = math.tanh %20 : vector<32x128xf32>
    %c0_17 = arith.constant 0 : index
    %c0_18 = arith.constant 0 : index
    %22 = vector.load %arg9[%c0_17, %c0_18] : memref<8x32xf32, #tpu.memory_space<vmem>>, vector<8x32xf32>
    %cst_19 = arith.constant dense<0.000000e+00> : vector<8x128xf32>
    %23 = tpu.matmul %22, %21, %cst_19 {dimension_numbers = #tpu.dot_dimension_numbers<[1], [0], [0], [1], [0, 0, 1, 1], [], []>} : vector<8x32xf32>, vector<32x128xf32>, vector<8x128xf32> -> vector<8x128xf32>
    %c0_20 = arith.constant 0 : index
    %c0_21 = arith.constant 0 : index
    %24 = vector.load %arg10[%c0_20, %c0_21] : memref<8x1xf32, #tpu.memory_space<vmem>>, vector<8x1xf32>
    %25 = vector.broadcast %24 : vector<8x1xf32> to vector<8x128xf32>
    %26 = arith.addf %23, %25 : vector<8x128xf32>
    %c0_22 = arith.constant 0 : index
    %c0_23 = arith.constant 0 : index
    %27 = vector.load %arg11[%c0_22, %c0_23] : memref<8x1xf32, #tpu.memory_space<vmem>>, vector<8x1xf32>
    %28 = math.exp %27 : vector<8x1xf32>
    %29 = vector.broadcast %28 : vector<8x1xf32> to vector<8x128xf32>
    %30 = arith.mulf %29, %3 : vector<8x128xf32>
    %31 = arith.addf %26, %30 : vector<8x128xf32>
    %c0_24 = arith.constant 0 : index
    %c0_25 = arith.constant 0 : index
    %32 = vector.load %arg12[%c0_24, %c0_25] : memref<24x128xf32, #tpu.memory_space<vmem>>, vector<8x128xf32>
    tpu.vector_store %arg12[%c0_24, %c0_25], %31 {strides = array<i32>} : memref<24x128xf32, #tpu.memory_space<vmem>>, vector<8x128xf32>,
    %33 = arith.mulf %3, %3 : vector<8x128xf32>
    %cst_26 = arith.constant -5.000000e-01 : f32
    %34 = vector.broadcast %cst_26 : f32 to vector<8x128xf32>
    %35 = arith.mulf %34, %33 : vector<8x128xf32>
    %36 = vector.broadcast %27 : vector<8x1xf32> to vector<8x128xf32>
    %37 = arith.subf %35, %36 : vector<8x128xf32>
    %cst_27 = arith.constant 0.918938517 : f32
    %38 = vector.broadcast %cst_27 : f32 to vector<8x128xf32>
    %39 = arith.subf %37, %38 : vector<8x128xf32>
    %c8 = arith.constant 8 : index
    %c0_28 = arith.constant 0 : index
    %40 = vector.load %arg12[%c8, %c0_28] : memref<24x128xf32, #tpu.memory_space<vmem>>, vector<8x128xf32>
    tpu.vector_store %arg12[%c8, %c0_28], %39 {strides = array<i32>} : memref<24x128xf32, #tpu.memory_space<vmem>>, vector<8x128xf32>,
    %c16 = arith.constant 16 : index
    %c0_29 = arith.constant 0 : index
    %41 = vector.load %arg12[%c16, %c0_29] : memref<24x128xf32, #tpu.memory_space<vmem>>, vector<8x128xf32>
    tpu.vector_store %arg12[%c16, %c0_29], %26 {strides = array<i32>} : memref<24x128xf32, #tpu.memory_space<vmem>>, vector<8x128xf32>,
    return
  }
  func.func @transform_0(%arg0: i32) -> (i32, i32) {
    %c0_i32 = arith.constant 0 : i32
    %c0_i32_0 = arith.constant 0 : i32
    return %arg0, %c0_i32 : i32, i32
  }
  func.func @transform_1(%arg0: i32) -> (i32, i32) {
    %c0_i32 = arith.constant 0 : i32
    %c0_i32_0 = arith.constant 0 : i32
    return %arg0, %c0_i32 : i32, i32
  }
  func.func @transform_2(%arg0: i32) -> (i32, i32) {
    %c0_i32 = arith.constant 0 : i32
    %c0_i32_0 = arith.constant 0 : i32
    %c0_i32_1 = arith.constant 0 : i32
    return %c0_i32, %c0_i32_0 : i32, i32
  }
  func.func @transform_3(%arg0: i32) -> (i32, i32) {
    %c0_i32 = arith.constant 0 : i32
    %c0_i32_0 = arith.constant 0 : i32
    %c0_i32_1 = arith.constant 0 : i32
    return %c0_i32, %c0_i32_0 : i32, i32
  }
  func.func @transform_4(%arg0: i32) -> (i32, i32) {
    %c0_i32 = arith.constant 0 : i32
    %c0_i32_0 = arith.constant 0 : i32
    %c0_i32_1 = arith.constant 0 : i32
    return %c0_i32, %c0_i32_0 : i32, i32
  }
  func.func @transform_5(%arg0: i32) -> (i32, i32) {
    %c0_i32 = arith.constant 0 : i32
    %c0_i32_0 = arith.constant 0 : i32
    %c0_i32_1 = arith.constant 0 : i32
    return %c0_i32, %c0_i32_0 : i32, i32
  }
  func.func @transform_6(%arg0: i32) -> (i32, i32) {
    %c0_i32 = arith.constant 0 : i32
    %c0_i32_0 = arith.constant 0 : i32
    %c0_i32_1 = arith.constant 0 : i32
    return %c0_i32, %c0_i32_0 : i32, i32
  }
  func.func @transform_7(%arg0: i32) -> (i32, i32) {
    %c0_i32 = arith.constant 0 : i32
    %c0_i32_0 = arith.constant 0 : i32
    %c0_i32_1 = arith.constant 0 : i32
    return %c0_i32, %c0_i32_0 : i32, i32
  }
  func.func @transform_8(%arg0: i32) -> (i32, i32) {
    %c0_i32 = arith.constant 0 : i32
    %c0_i32_0 = arith.constant 0 : i32
    %c0_i32_1 = arith.constant 0 : i32
    return %c0_i32, %c0_i32_0 : i32, i32
  }
  func.func @transform_9(%arg0: i32) -> (i32, i32) {
    %c0_i32 = arith.constant 0 : i32
    %c0_i32_0 = arith.constant 0 : i32
    %c0_i32_1 = arith.constant 0 : i32
    return %c0_i32, %c0_i32_0 : i32, i32
  }
  func.func @transform_10(%arg0: i32) -> (i32, i32) {
    %c0_i32 = arith.constant 0 : i32
    %c0_i32_0 = arith.constant 0 : i32
    %c0_i32_1 = arith.constant 0 : i32
    return %c0_i32, %c0_i32_0 : i32, i32
  }
  func.func @transform_11(%arg0: i32) -> (i32, i32) {
    %c0_i32 = arith.constant 0 : i32
    %c0_i32_0 = arith.constant 0 : i32
    return %c0_i32, %arg0 : i32, i32
  }
}

</mosaic_0001>

<bundles_post_ra>
// kernel: tpu_custom_call.1
= control target key start
LH: loop header
LB: loop body
LE: loop exit
PB: predicated region body
PF: predicated region fallthrough
CT: control target
= control target key end

     0   :  { %vm131_vm0 = vcmask 130048   ;;  %v935_v6 = vmov 0   ;;  %s1260_s0 = inlined_call_operand.vmem [shape: f32[128,16], index: 0, kind: input, shape index: {}]   ;;  %s1261_s1 = inlined_call_operand.vmem [shape: f32[128,8], index: 1, kind: input, shape index: {}]   ;;  %s1262_s2 = inlined_call_operand.vmem [shape: f32[32,16], index: 2, kind: input, shape index: {}]   ;;  %s1263_s3 = inlined_call_operand.vmem [shape: f32[32,1], index: 3, kind: input, shape index: {}]   ;;  %s1264_s4 = inlined_call_operand.vmem [shape: f32[32,32], index: 4, kind: input, shape index: {}]   ;;  %s1265_s5 = inlined_call_operand.vmem [shape: f32[32,1], index: 5, kind: input, shape index: {}]   ;;  %s1266_s6 = inlined_call_operand.vmem [shape: f32[32,32], index: 6, kind: input, shape index: {}]   ;;  %s1267_s7 = inlined_call_operand.vmem [shape: f32[32,1], index: 7, kind: input, shape index: {}]   ;;  %s1268_s8 = inlined_call_operand.vmem [shape: f32[8,32], index: 8, kind: input, shape index: {}]   ;;  %s1269_s9 = inlined_call_operand.vmem [shape: f32[8,1], index: 9, kind: input, shape index: {}]   ;;  %s1270_s10 = inlined_call_operand.vmem [shape: f32[8,1], index: 10, kind: input, shape index: {}]   ;;  %s1271_s11 = inlined_call_operand.hbm [shape: f32[24,128], index: 11, kind: output, shape index: {}]  }
   0x1   :  { %v39_v0 = vld [vmem:[%s1260_s0] sm:$0xff]  ;;  %v40_v1 = vld [vmem:[%s1260_s0 + $0x8] sm:$0xff]  ;;  %v41_v2 = vld [vmem:[%s1260_s0 + $0x10] sm:$0xff]  ;;  %884 = vset.pattern.permute.xlu1 %v935_v6  ;;  %883 = vset.pattern.permute.xlu0 %v935_v6 }
   0x2   :  { %v806_v3 = vpack.c.bf16 %v40_v1, %v39_v0  ;;  %vm1013_vm1 = vmpackc.low %vm131_vm0, %vm131_vm0  ;;  %v42_v5 = vld [vmem:[%s1260_s0 + $0x18] sm:$0xff]  ;;  %v103_v8 = vld [vmem:[%s1262_s2] sm:$0xff] }
   0x3   :  { %v812_v7 = vpack.c.bf16 %v42_v5, %v41_v2  ;;  %v43_v9 = vld [vmem:[%s1260_s0 + $0x20] sm:$0xff]  ;;  %v44_v10 = vld [vmem:[%s1260_s0 + $0x28] sm:$0xff]  ;;  %761 = vmatprep.mubr.msk.f32.mxu0 %vm131_vm0, %v103_v8  ;;  %v109_v11 = vld [vmem:[%s1263_s3 + $0x10] sm:$0xff] }
   0x4   :  { %808 = vmatprep.subr.msk.bf16.mxu0 %vm1013_vm1, %v806_v3  ;;  %123 = vperm.xlu1 %884, %v109_v11   ;;  %v818_v12 = vpack.c.bf16 %v44_v10, %v43_v9  ;;  %v110_v13 = vld [vmem:[%s1263_s3 + $0x18] sm:$0xff]  ;;  %v107_v14 = vld [vmem:[%s1263_s3] sm:$0xff]  ;;  %v108_v15 = vld [vmem:[%s1263_s3 + $0x8] sm:$0xff] }
   0x5   :  { %811 = vmatpush3.bf16.xpose.msk.msra.mxu0 %vm1013_vm1, %v806_v3  ;;  %113 = vperm.xlu0 %883, %v107_v14   ;;  %v620_v16 = vld [vmem:[%s1270_s10] sm:$0xff]  ;;  %v286_v17 = vld [vmem:[%s1265_s5 + $0x8] sm:$0xff]  ;;  %v45_v18 = vld [vmem:[%s1260_s0 + $0x30] sm:$0xff] }
   0x6   :  { %814 = vmatprep.subr.msk.bf16.mxu0 %vm1013_vm1, %v812_v7  ;;  %v46_v19 = vld [vmem:[%s1260_s0 + $0x38] sm:$0xff]  ;;  %v621_v20 = vmul.f32 1.442695, %v620_v16  ;;  %v285_v21 = vld [vmem:[%s1265_s5] sm:$0xff] }
   0x7   :  { %v824_v22 = vpack.c.bf16 %v46_v19, %v45_v18  ;;  %v288_v23 = vld [vmem:[%s1265_s5 + $0x18] sm:$0xff] }
   0x8   :  { %128 = vperm.xlu1 %884, %v110_v13  }
   0x9   :  { %118 = vperm.xlu0 %883, %v108_v15  }
   0xc   :  { %296 = vperm.xlu1 %884, %v286_v17  }
   0xd   :  { %817 = vmatpush3.bf16.xpose.msk.msra.mxu0 %vm1013_vm1, %v812_v7 }
   0xe   :  { %820 = vmatprep.subr.msk.bf16.mxu0 %vm1013_vm1, %v818_v12 }
   0xf   :  { %16 = vsyncpa [#allocation3], 0  ;;  %291 = vperm.xlu0 %883, %v285_v21   ;;  %885 = vpow2.f32 %v621_v20  ;;  %v287_v24 = vld [vmem:[%s1265_s5 + $0x10] sm:$0xff]  ;;  %v416_v25 = vld [vmem:[%s1267_s7 + $0x8] sm:$0xff]  ;;  %vm309_vm2 = vcmask 261120   ;;  %vm937_vm3 = vmmov 0  }
  0x10   :  { %306 = vperm.xlu1 %884, %v288_v23   ;;  %v47_v26 = vld [vmem:[%s1260_s0 + $0x40] sm:$0xff]  ;;  %v48_v27 = vld [vmem:[%s1260_s0 + $0x48] sm:$0xff]  ;;  %v418_v30 = vld [vmem:[%s1267_s7 + $0x18] sm:$0xff]  ;;  %s939_s16 = smov [#allocation2]  }
  0x11   :  { %v415_v28 = vld [vmem:[%s1267_s7] sm:$0xff]  ;;  %v830_v29 = vpack.c.bf16 %v48_v27, %v47_v26  ;;  %v417_v31 = vld [vmem:[%s1267_s7 + $0x10] sm:$0xff]  ;;  %v50_v34 = vld [vmem:[%s1260_s0 + $0x58] sm:$0xff]  ;;  %s647_s17 = sshll.u32 %s939_s16, 4  ;;  %s648_s17 = int_to_ptr.vmem [resolvable:$true] %s647_s17 }
  0x12   :  { %v49_v33 = vld [vmem:[%s1260_s0 + $0x50] sm:$0xff]  ;;  %v541_v35 = vld [vmem:[%s1269_s9] sm:$0xff]  ;;  %v52_v38 = vld [vmem:[%s1260_s0 + $0x68] sm:$0xff]  ;;  %s911_s18 = scalar_lea.vmem %s648_s17, 384  ;;  %p916_p1 = scmp.lt.s32.totalorder %s648_s17, %s648_s17 }
  0x13   :  { %301 = vperm.xlu0 %883, %v287_v24   ;;  %v836_v36 = vpack.c.bf16 %v50_v34, %v49_v33  ;;  %v51_v37 = vld [vmem:[%s1260_s0 + $0x60] sm:$0xff]  ;;  %v53_v40 = vld [vmem:[%s1260_s0 + $0x70] sm:$0xff]  ;;  %v54_v41 = vld [vmem:[%s1260_s0 + $0x78] sm:$0xff]  ;;  %p912_p0 = scmp.ne.s32.totalorder %s648_s17, %s911_s18  ;;  %p917_p2 = scmp.lt.s32.totalorder %s911_s18, %s911_s18 }
  0x14   :  { %426 = vperm.xlu1 %884, %v416_v25   ;;  %v842_v39 = vpack.c.bf16 %v52_v38, %v51_v37  ;;  %v848_v42 = vpack.c.bf16 %v54_v41, %v53_v40  ;;  %v104_v43 = vld [vmem:[%s1262_s2 + $0x8] sm:$0xff]  ;;  %v105_v44 = vld [vmem:[%s1262_s2 + $0x10] sm:$0xff]  ;;  %v106_v45 = vld [vmem:[%s1262_s2 + $0x18] sm:$0xff] }
  0x15   :  { %823 = vmatpush3.bf16.xpose.msk.msra.mxu0 %vm1013_vm1, %v818_v12  ;;  %v55_v46 = vld [vmem:[%s1261_s1] sm:$0xff]  ;;  %v56_v47 = vld [vmem:[%s1261_s1 + $0x8] sm:$0xff]  ;;  %v57_v48 = vld [vmem:[%s1261_s1 + $0x10] sm:$0xff]  ;;  %p918_p3 = por %p917_p2, %p916_p1 }
  0x16   :  { %826 = vmatprep.subr.msk.bf16.mxu0 %vm1013_vm1, %v824_v22  ;;  %v58_v49 = vld [vmem:[%s1261_s1 + $0x18] sm:$0xff]  ;;  %v59_v50 = vld [vmem:[%s1261_s1 + $0x20] sm:$0xff]  ;;  %v60_v51 = vld [vmem:[%s1261_s1 + $0x28] sm:$0xff] }
  0x17   :  { %421 = vperm.xlu0 %883, %v415_v28   ;;  %v61_v52 = vld [vmem:[%s1261_s1 + $0x30] sm:$0xff]  ;;  %v62_v53 = vld [vmem:[%s1261_s1 + $0x38] sm:$0xff]  ;;  %v63_v54 = vld [vmem:[%s1261_s1 + $0x40] sm:$0xff]  ;;  %p919_p4 = pnand %p918_p3, %p912_p0 }
  0x18   :  { %436 = vperm.xlu1 %884, %v418_v30   ;;  %v64_v55 = vld [vmem:[%s1261_s1 + $0x48] sm:$0xff]  ;;  %v65_v56 = vld [vmem:[%s1261_s1 + $0x50] sm:$0xff]  ;;  %v66_v57 = vld [vmem:[%s1261_s1 + $0x58] sm:$0xff] }
  0x19   :  { %v886_v32 = vpop.eup %885  ;;  %v67_v58 = vld [vmem:[%s1261_s1 + $0x60] sm:$0xff]  ;;  %v68_v59 = vld [vmem:[%s1261_s1 + $0x68] sm:$0xff]  ;;  %v69_v60 = vld [vmem:[%s1261_s1 + $0x70] sm:$0xff] }
  0x1a   :  { %v70_v61 = vld [vmem:[%s1261_s1 + $0x78] sm:$0xff]  ;;  %v281_v3 = vld [vmem:[%s1264_s4] sm:$0xff]  ;;  %v282_v34 = vld [vmem:[%s1264_s4 + $0x8] sm:$0xff] }
  0x1b   :  { %431 = vperm.xlu0 %883, %v417_v31   ;;  %775 = vmatprep.mubr.msk.f32.mxu1 %vm309_vm2, %v281_v3  ;;  %v411_v37 = vld [vmem:[%s1266_s6] sm:$0xff] }
  0x1c   :  { %625 = vperm.xlu1 %884, %v886_v32  }
  0x1d   :  { %829 = vmatpush3.bf16.xpose.msk.msra.mxu0 %vm1013_vm1, %v824_v22 }
  0x1e   :  { %832 = vmatprep.subr.msk.bf16.mxu0 %vm1013_vm1, %v830_v29 }
  0x1f   :  { %544 = vperm.xlu0 %883, %v541_v35   ;;  %v283_v35 = vld [vmem:[%s1264_s4 + $0x10] sm:$0xff] }
  0x23   :  { %635 = vperm.xlu0 %883, %v620_v16  }
  0x25   :  { %835 = vmatpush3.bf16.xpose.msk.msra.mxu0 %vm1013_vm1, %v830_v29 }
  0x26   :  { %838 = vmatprep.subr.msk.bf16.mxu0 %vm1013_vm1, %v836_v36 }
  0x2d   :  { %841 = vmatpush3.bf16.xpose.msk.msra.mxu0 %vm1013_vm1, %v836_v36  ;;  %v284_v36 = vld [vmem:[%s1264_s4 + $0x18] sm:$0xff] }
  0x2e   :  { %844 = vmatprep.subr.msk.bf16.mxu0 %vm1013_vm1, %v842_v39 }
  0x35   :  { %847 = vmatpush3.bf16.xpose.msk.msra.mxu0 %vm1013_vm1, %v842_v39 }
  0x36   :  { %850 = vmatprep.subr.msk.bf16.mxu0 %vm1013_vm1, %v848_v42 }
  0x3d   :  { %853 = vmatpush3.bf16.xpose.msk.msra.mxu0 %vm1013_vm1, %v848_v42 }
  0x44   :  { %762 = vmatmul.mubr.msk.f32.vlgmr.msra.gmra.mrb[0].mxu0 %vm131_vm0, %v104_v43 }
  0x45   :  { %764 = vmatprep.mubr.msk.f32.mxu0 %vm131_vm0, %v105_v44  ;;  %71 = vxpose.xlu1.b32.start [1/16] (narrow) %v55_v46, 8 }
  0x48   :  { %765 = vmatmul.mubr.msk.f32.gmra.mrb[2].mxu0 %vm131_vm0, %v106_v45 }
  0x49   :  { %72 = vxpose.xlu1.b32.cont [2/16] (narrow) %v56_v47, 8 }
  0x4d   :  { %73 = vxpose.xlu1.b32.cont [3/16] (narrow) %v57_v48, 8 }
  0x51   :  { %74 = vxpose.xlu1.b32.cont [4/16] (narrow) %v58_v49, 8 }
  0x55   :  { %75 = vxpose.xlu1.b32.cont [5/16] (narrow) %v59_v50, 8 }
  0x59   :  { %76 = vxpose.xlu1.b32.cont [6/16] (narrow) %v60_v51, 8 }
  0x5d   :  { %77 = vxpose.xlu1.b32.cont [7/16] (narrow) %v61_v52, 8  ;;  %v412_v52 = vld [vmem:[%s1266_s6 + $0x8] sm:$0xff] }
  0x61   :  { %78 = vxpose.xlu1.b32.cont [8/16] (narrow) %v62_v53, 8  ;;  %v413_v53 = vld [vmem:[%s1266_s6 + $0x10] sm:$0xff] }
  0x65   :  { %79 = vxpose.xlu1.b32.cont [9/16] (narrow) %v63_v54, 8  ;;  %v414_v54 = vld [vmem:[%s1266_s6 + $0x18] sm:$0xff] }
  0x69   :  { %80 = vxpose.xlu1.b32.cont [10/16] (narrow) %v64_v55, 8  ;;  %v936_v55 = vmov 0.0|0.0  }
  0x6d   :  { %81 = vxpose.xlu1.b32.cont [11/16] (narrow) %v65_v56, 8  ;;  %v938_v56 = vmov 0.0  }
  0x71   :  { %82 = vxpose.xlu1.b32.cont [12/16] (narrow) %v66_v57, 8 }
  0x75   :  { %83 = vxpose.xlu1.b32.cont [13/16] (narrow) %v67_v58, 8 }
  0x79   :  { %84 = vxpose.xlu1.b32.cont [14/16] (narrow) %v68_v59, 8 }
  0x7d   :  { %85 = vxpose.xlu1.b32.cont [15/16] (narrow) %v69_v60, 8 }
  0x81   :  { %86 = vxpose.xlu1.b32.end [16/16] (narrow) %v70_v61, 8 }
  0x83   :  { %v124_v62 = vpop.permute.xlu1 %123 }
  0x84   :  { %v114_v63 = vpop.permute.xlu0 %113 }
  0x87   :  { %v129_v0 = vpop.permute.xlu1 %128 }
  0x88   :  { %v119_v1 = vpop.permute.xlu0 %118 }
  0x8b   :  { %v297_v2 = vpop.permute.xlu1 %296 }
  0x8e   :  { %v292_v4 = vpop.permute.xlu0 %291 }
  0x8f   :  { %v307_v5 = vpop.permute.xlu1 %306 }
  0x92   :  { %v302_v6 = vpop.permute.xlu0 %301 }
  0x93   :  { %v1198_v7 = vpop.permute.xlu1 %426 }
  0x96   :  { %v1200_v8 = vpop.permute.xlu0 %421 }
  0x97   :  { %v1202_v9 = vpop.permute.xlu1 %436 }
  0x9a   :  { %v1204_v10 = vpop.permute.xlu0 %431 }
  0x9b   :  { %v626_v11 = vpop.permute.xlu1 %625 }
  0x9e   :  { %v1206_v12 = vpop.permute.xlu0 %544 }
  0xa2   :  { %v636_v16 = vpop.permute.xlu0 %635 }
  0xc5   :  { %v87_v13 = vpop.trf.xlu1 }
  0xc6   :  { %v1208_v14 = vmul.f32 %v626_v11, %v87_v13  ;;  %v631_v15 = vmul.f32 %v87_v13, %v87_v13 }
  0xc8   :  { %v632_v17 = vmul.f32 -0.5, %v631_v15 }
  0xca   :  { %v638_v18 = vsub.f32 %v632_v17, %v636_v16 }
  0xcc   :  { %v687_v19 = vadd.f32 -0.9189385, %v638_v18 }
  0xce   :  { %640 = vst [vmem:[#allocation2 + $0x8] sm:$0xff] %v687_v19 }
 0x117   :  { %v763_v20 = vpop.f32.mrb[0].mxu0 }
 0x118   :  { %v264_v21 = vadd.f32 %v763_v20, %v119_v1  ;;  %v258_v22 = vpop.f32.mrb[1].mxu0 }
 0x119   :  { %v259_v23 = vadd.f32 %v258_v22, %v114_v63 }
 0x11a   :  { %887 = vtanh.f32 %v264_v21 }
 0x11b   :  { %889 = vtanh.f32 %v259_v23  ;;  %v766_v24 = vpop.f32.mrb[2].mxu0 }
 0x11c   :  { %v274_v25 = vadd.f32 %v766_v24, %v129_v0  ;;  %v268_v26 = vpop.f32.mrb[3].mxu0 }
 0x11d   :  { %v269_v27 = vadd.f32 %v268_v26, %v124_v62 }
 0x11e   :  { %891 = vtanh.f32 %v274_v25 }
 0x11f   :  { %893 = vtanh.f32 %v269_v27 }
 0x124   :  { %v888_v28 = vpop.eup %887 }
 0x125   :  { %v890_v29 = vpop.eup %889 }
 0x126   :  { %v854_v30 = vpack.c.bf16 %v888_v28, %v890_v29 }
 0x128   :  { %v892_v31 = vpop.eup %891  ;;  %855 = vmatprep.subr.bf16.mxu1 %v854_v30 }
 0x129   :  { %v894_v32 = vpop.eup %893  ;;  %857 = vmatpush3.bf16.msra.mxu1 %v854_v30 }
 0x12a   :  { %v858_v33 = vpack.c.bf16 %v892_v31, %v894_v32 }
 0x12c   :  { %859 = vmatprep.subr.bf16.mxu1 %v858_v33 }
 0x12d   :  { %861 = vmatpush3.bf16.msra.mxu1 %v858_v33 }
 0x130   :  { %776 = vmatmul.mubr.msk.f32.vlgmr.msra.gmra.mrb[0].mxu1 %vm309_vm2, %v282_v34 }
 0x131   :  { %778 = vmatprep.mubr.msk.f32.mxu1 %vm309_vm2, %v283_v35 }
 0x134   :  { %779 = vmatmul.mubr.msk.f32.gmra.mrb[2].mxu1 %vm309_vm2, %v284_v36 }
 0x135   :  { %789 = vmatprep.mubr.msk.f32.mxu1 %vm309_vm2, %v411_v37 }
 0x203   :  { %v777_v38 = vpop.f32.mrb[0].mxu1 }
 0x204   :  { %v394_v39 = vadd.f32 %v777_v38, %v297_v2  ;;  %v388_v40 = vpop.f32.mrb[1].mxu1 }
 0x205   :  { %v389_v41 = vadd.f32 %v388_v40, %v292_v4 }
 0x206   :  { %895 = vtanh.f32 %v394_v39 }
 0x207   :  { %897 = vtanh.f32 %v389_v41  ;;  %v780_v42 = vpop.f32.mrb[2].mxu1 }
 0x208   :  { %v404_v43 = vadd.f32 %v780_v42, %v307_v5  ;;  %v398_v44 = vpop.f32.mrb[3].mxu1 }
 0x209   :  { %v399_v45 = vadd.f32 %v398_v44, %v302_v6 }
 0x20a   :  { %899 = vtanh.f32 %v404_v43 }
 0x20b   :  { %901 = vtanh.f32 %v399_v45 }
 0x210   :  { %v896_v46 = vpop.eup %895 }
 0x211   :  { %v898_v47 = vpop.eup %897 }
 0x212   :  { %v862_v48 = vpack.c.bf16 %v896_v46, %v898_v47 }
 0x214   :  { %v900_v49 = vpop.eup %899  ;;  %863 = vmatprep.subr.bf16.mxu1 %v862_v48 }
 0x215   :  { %v902_v50 = vpop.eup %901  ;;  %865 = vmatpush3.bf16.msra.mxu1 %v862_v48 }
 0x216   :  { %v866_v51 = vpack.c.bf16 %v900_v49, %v902_v50 }
 0x218   :  { %867 = vmatprep.subr.bf16.mxu1 %v866_v51 }
 0x219   :  { %869 = vmatpush3.bf16.msra.mxu1 %v866_v51 }
 0x21a   :  { %870 = vmatprep.subr.bf16.mxu1 %v936_v55 }
 0x21c   :  { %790 = vmatmul.mubr.msk.f32.vlgmr.msra.gmra.mrb[4].mxu1 %vm309_vm2, %v412_v52 }
 0x21d   :  { %792 = vmatprep.mubr.msk.f32.mxu1 %vm309_vm2, %v413_v53 }
 0x220   :  { %793 = vmatmul.mubr.msk.f32.gmra.mrb[6].mxu1 %vm309_vm2, %v414_v54 }
 0x221   :  { %803 = vmatprep.mubr.msk.f32.mxu1 %vm937_vm3, %v938_v56 }
 0x2ef   :  { %v791_v57 = vpop.f32.mrb[4].mxu1 }
 0x2f0   :  { %v523_v58 = vadd.f32 %v791_v57, %v1198_v7  ;;  %v517_v59 = vpop.f32.mrb[5].mxu1  ;;  %v540_v7 = vld [vmem:[%s1268_s8] sm:$0xff] }
 0x2f1   :  { %v518_v60 = vadd.f32 %v517_v59, %v1200_v8 }
 0x2f2   :  { %903 = vtanh.f32 %v523_v58 }
 0x2f3   :  { %905 = vtanh.f32 %v518_v60  ;;  %v794_v61 = vpop.f32.mrb[6].mxu1 }
 0x2f4   :  { %v533_v62 = vadd.f32 %v794_v61, %v1202_v9  ;;  %v527_v63 = vpop.f32.mrb[7].mxu1 }
 0x2f5   :  { %v528_v0 = vadd.f32 %v527_v63, %v1204_v10 }
 0x2f6   :  { %907 = vtanh.f32 %v533_v62 }
 0x2f7   :  { %909 = vtanh.f32 %v528_v0 }
 0x2fc   :  { %v904_v1 = vpop.eup %903 }
 0x2fd   :  { %v906_v2 = vpop.eup %905 }
 0x2fe   :  { %v871_v3 = vpack.c.bf16 %v904_v1, %v906_v2 }
 0x300   :  { %v908_v4 = vpop.eup %907  ;;  %872 = vmatpush3.bf16.msra.mxu1 %v871_v3 }
 0x301   :  { %v910_v5 = vpop.eup %909  ;;  %873 = vmatprep.subr.bf16.mxu1 %v936_v55 }
 0x302   :  { %v874_v6 = vpack.c.bf16 %v908_v4, %v910_v5 }
 0x304   :  { %875 = vmatpush3.bf16.msra.mxu1 %v874_v6 }
 0x307   :  { %804 = vmatmul.mubr.msk.f32.vlgmr.msra.gmra.mrb[8].mxu1 %vm309_vm2, %v540_v7 }
 0x3da   :  { %v616_v8 = vpop.f32.mrb[8].mxu1 }
 0x3db   :  { %v617_v9 = vadd.f32 %v616_v8, %v1206_v12  ;;  %v805_v10 = vpop.f32.mrb[9].mxu1 }
 0x3dd   :  { %v629_v11 = vadd.f32 %v1208_v14, %v617_v9  ;;  %641 = vst [vmem:[#allocation2 + $0x10] sm:$0xff] %v617_v9 }
 0x3df   :  { %630 = vst [vmem:[#allocation2] sm:$0xff] %v629_v11 }
 0x3e0   :  { %922 = shalt.err (!%p919_p4)
}
 0x3e1   :  { %s923_s5 = scalar_lea.hbm %s1271_s11, 384 }
 0x3e2   :  { %p924_p5 = scmp.ne.s32.totalorder %s1271_s11, %s923_s5  ;;  %p927_p6 = scmp.lt.u32.totalorder %s923_s5, %s1271_s11 }
 0x3e4   :  { %p929_p7 = pnand %p927_p6, %p924_p5 }
 0x3e6   :  { %932 = shalt.err (!%p929_p7)
}
 0x3e7   :  { %s940_s23 = smov 128   ;;  %s941_s24 = smov 8  }
 0x3e8   :  { %653 = dma.vmem_to_hbm [thread:$0]  %s648_s17, 384, %s1271_s11, [#allocation3], %s940_s23, %s940_s23, %s941_s24  }
 0x3e9   :  { %933 = dma.done.wait [#allocation3], 384  }
 0x3ea   :  { %934 = vsyncadd [#allocation3], 4294966912 }
 0x3eb   :  { %657 = vsyncpa [#allocation3], 1 }

</bundles_post_ra>
